<compile_context>
chip_gen: v7x
topology: tpu7x:2x2x1
jax: 0.10.0
libtpu: 0.0.40
codegen_flags: <defaults>
</compile_context>

<pallas_src>
import jax
import jax.numpy as jnp
from jax.experimental import pallas as pl
from jax.experimental.pallas import tpu as pltpu

_LANE = 128


def _round_up(x: int, m: int) -> int:
    return -(-x // m) * m


# ---------------------------------------------------------------------------
# Kernels (pure XLU transposes of VMEM tiles; XLU slot is separate from
# vld/vst so the transpose hides under the DMA traffic).
# ---------------------------------------------------------------------------
def _transpose2d_kernel(x_ref, o_ref):
    # x_ref: (tT, tC) VMEM tile; o_ref: (tC, tT).  Batch dim is squeezed.
    o_ref[...] = jnp.transpose(x_ref[...])


def _transpose3d_kernel(x_ref, o_ref):
    # x_ref: (bt, T, C) VMEM tile; o_ref: (bt, C, T).
    o_ref[...] = jnp.transpose(x_ref[...], (0, 2, 1))


def _make_in_spec(block_shape, index_map, input_buffers):
    if input_buffers == 2:
        return pl.BlockSpec(block_shape, index_map)
    # Extra input buffering to hide exposed DMA-issue latency (costs one more
    # tile of VMEM).  Only constructed when explicitly requested.
    return pl.BlockSpec(block_shape, index_map,
                        pipeline_mode=pl.Buffered(input_buffers))


# ---------------------------------------------------------------------------
# Wrapper
# ---------------------------------------------------------------------------
def pallas_transpose_1_2(
    x: jax.Array,
    *,
    min_pallas_bytes: int = 512 * 1024,     # below this: plain jnp.swapaxes
    small_plane_bytes: int = 512 * 1024,    # below this: batch-blocked path
    target_step_bytes: int = 2 << 20,       # ~2 MiB moved per grid step
    vmem_live_cap_bytes: int = 24 << 20,    # 4-buffer live cap (v7x-safe)
    tile_t: int | None = None,              # optional overrides (128-multiples
    tile_c: int | None = None,              #   unless >= the full extent)
    input_buffers: int = 2,
    vmem_limit_bytes: int | None = None,
) -> jax.Array:
    """Swap dims 1 and 2 of a rank-3 array (== torch.transpose(x, 1, 2))."""
    assert x.ndim == 3, x.shape
    B, T, C = x.shape
    itemsize = jnp.dtype(x.dtype).itemsize
    total_bytes = B * T * C * itemsize
    plane_bytes = T * C * itemsize
    out_shape = jax.ShapeDtypeStruct((B, C, T), x.dtype)

    # ---- (1) tiny tensors: launching a kernel can only lose ---------------
    if total_bytes <= min_pallas_bytes:
        return jnp.swapaxes(x, 1, 2)

    if plane_bytes <= small_plane_bytes and tile_t is None and tile_c is None:
        # ---- small-plane path: batch-blocked full (T, C) planes -----------
        # Pack many batch elements per grid step so each step moves ~2 MiB
        # and the ~0.35us/step overhead amortizes.  Block last-two dims equal
        # the full array dims, so no (8,128) constraint issue for tiny T / C.
        bt = int(max(1, min(B, target_step_bytes // max(plane_bytes, 1))))
        grid = (pl.cdiv(B, bt),)
        in_specs = [_make_in_spec((bt, T, C), lambda b: (b, 0, 0),
                                  input_buffers)]
        out_spec = pl.BlockSpec((bt, C, T), lambda b: (b, 0, 0))
        dims = ("parallel",)
        kernel = _transpose3d_kernel
        block_elems = bt * T * C
    else:
        # ---- tiled path ----------------------------------------------------
        tc_min = max(_LANE, _round_up(max(1, 2048 // itemsize), _LANE))
        c_pad = _round_up(C, _LANE)

        if tile_t is not None or tile_c is not None:
            tT = T if (tile_t is None or tile_t >= T) else int(tile_t)
            tC = C if (tile_c is None or tile_c >= C) else int(tile_c)
        else:
            # Largest 128-multiple tC keeping 2x(in)+2x(out) buffers with
            # tT = T under the live-VMEM cap.
            tc_cap = (vmem_live_cap_bytes // (4 * T * itemsize)) // _LANE * _LANE
            if tc_cap >= _LANE:
                # Contiguous-write variant: output block (tC, T) is a fully
                # contiguous region of the (C, T) plane.
                tT = T
                tc_want = _round_up(
                    max(1, target_step_bytes // (T * itemsize)), _LANE)
                tC = min(max(tc_min, tc_want), tc_cap, c_pad)
                if tC >= C:
                    tC = C
            else:
                # T too large for a full-extent tile: 128-multiple tiles on
                # both axes, T-tile axis placed innermost below for write-side
                # locality.
                tC = min(tc_min, c_pad)
                if tC >= C:
                    tC = C
                tt_cap = (vmem_live_cap_bytes
                          // (4 * max(tC, 1) * itemsize)) // _LANE * _LANE
                tt_want = _round_up(
                    max(1, target_step_bytes // (max(tC, 1) * itemsize)), _LANE)
                tT = max(_LANE, min(tt_want, max(tt_cap, _LANE),
                                    _round_up(T, _LANE)))
                if tT >= T:
                    tT = T

        n_c = pl.cdiv(C, tC)
        n_t = pl.cdiv(T, tT)
        kernel = _transpose2d_kernel
        block_elems = tT * tC

        if tT == T:
            # 2-D grid: (batch, C-tile).  Batch outermost so v7x's 2 TCs split
            # by batch when B>=2; inner axis gives contiguous consecutive
            # output writes along C.
            if B > 1:
                grid = (B, n_c)
                in_specs = [_make_in_spec(
                    (pl.Squeezed(), T, tC), lambda b, j: (b, 0, j),
                    input_buffers)]
                out_spec = pl.BlockSpec((pl.Squeezed(), tC, T),
                                        lambda b, j: (b, j, 0))
                dims = ("parallel", "parallel")
            else:
                grid = (n_c,)
                in_specs = [_make_in_spec(
                    (pl.Squeezed(), T, tC), lambda j: (0, 0, j),
                    input_buffers)]
                out_spec = pl.BlockSpec((pl.Squeezed(), tC, T),
                                        lambda j: (0, j, 0))
                dims = ("parallel",)
        else:
            # 3-D grid: (batch, C-tile, T-tile) -- T-tile innermost so
            # consecutive steps write adjacent blocks along the output's
            # minor (T) dimension.
            if B > 1:
                grid = (B, n_c, n_t)
                in_specs = [_make_in_spec(
                    (pl.Squeezed(), tT, tC), lambda b, j, i: (b, i, j),
                    input_buffers)]
                out_spec = pl.BlockSpec((pl.Squeezed(), tC, tT),
                                        lambda b, j, i: (b, j, i))
                dims = ("parallel", "parallel", "parallel")
            else:
                grid = (n_c, n_t)
                in_specs = [_make_in_spec(
                    (pl.Squeezed(), tT, tC), lambda j, i: (0, i, j),
                    input_buffers)]
                out_spec = pl.BlockSpec((pl.Squeezed(), tC, tT),
                                        lambda j, i: (0, j, i))
                dims = ("parallel", "parallel")

    # ---- VMEM limit from the actual live footprint (+headroom) ------------
    if vmem_limit_bytes is None:
        in_bufs = max(2, int(input_buffers))
        live = block_elems * itemsize * in_bufs + block_elems * itemsize * 2
        vmem_limit_bytes = int(max(live + (8 << 20), 32 << 20))

    cost = pl.CostEstimate(flops=0, transcendentals=0,
                           bytes_accessed=2 * total_bytes)

    return pl.pallas_call(
        kernel,
        out_shape=out_shape,
        grid_spec=pltpu.PrefetchScalarGridSpec(
            num_scalar_prefetch=0,
            grid=grid,
            in_specs=in_specs,
            out_specs=out_spec,
        ),
        compiler_params=pltpu.CompilerParams(
            dimension_semantics=dims,
            vmem_limit_bytes=int(vmem_limit_bytes),
        ),
        cost_estimate=cost,
    )(x)


class Transpose:
    """Pallas-backed analogue of the PyTorch Transpose(dim0, dim1) module."""

    def __init__(self, dim0: int, dim1: int):
        self.dim0 = dim0
        self.dim1 = dim1

    def __call__(self, x: jax.Array) -> jax.Array:
        d0 = self.dim0 % x.ndim
        d1 = self.dim1 % x.ndim
        if x.ndim == 3 and {d0, d1} == {1, 2}:
            return pallas_transpose_1_2(x)
        # TODO(synk): other (dim0, dim1) / ranks fall back to XLA's transpose
        # (usually a free layout assignment) rather than a standalone kernel.
        return jnp.swapaxes(x, d0, d1)


if __name__ == "__main__":
    key = jax.random.PRNGKey(0)
    ks = jax.random.split(key, 6)

    # 1) Real flow_matching shape (batch=2, seq=8, hidden=32): tiny tensor,
    #    dispatched to jnp.swapaxes (no Pallas launch), per the review.
    x0 = jax.random.normal(ks[0], (2, 8, 32), dtype=jnp.float32)
    y0 = jax.block_until_ready(Transpose(1, 2)(x0))
    assert y0.shape == (2, 32, 8) and y0.dtype == x0.dtype
    assert jnp.array_equal(y0, jnp.swapaxes(x0, 1, 2)), "early-out mismatch"

    # 2) Small-plane Pallas path (batch-blocked full planes), forced past the
    #    early-out.
    x1 = jax.random.normal(ks[1], (64, 8, 32), dtype=jnp.float32)
    y1 = jax.block_until_ready(pallas_transpose_1_2(x1, min_pallas_bytes=0))
    assert y1.shape == (64, 32, 8)
    assert jnp.array_equal(y1, jnp.swapaxes(x1, 1, 2)), "small-path mismatch"

    # 3) Tiled contiguous-write path (tT = T), f32, default heuristics.
    x2 = jax.random.normal(ks[2], (2, 384, 512), dtype=jnp.float32)
    y2 = jax.block_until_ready(pallas_transpose_1_2(x2))
    assert y2.shape == (2, 512, 384)
    assert jnp.array_equal(y2, jnp.swapaxes(x2, 1, 2)), "tiled-A mismatch"

    # 4) Tiled contiguous-write path with ragged C tiles (C=700, tC=128).
    x3 = jax.random.normal(ks[3], (2, 256, 700), dtype=jnp.float32)
    y3 = jax.block_until_ready(pallas_transpose_1_2(x3, tile_c=128))
    assert y3.shape == (2, 700, 256)
    assert jnp.array_equal(y3, jnp.swapaxes(x3, 1, 2)), "ragged-C mismatch"

    # 5) Two-axis tiling (tT < T) with ragged T tiles (T=600, 128x128 tiles).
    x4 = jax.random.normal(ks[4], (2, 600, 256), dtype=jnp.float32)
    y4 = jax.block_until_ready(
        pallas_transpose_1_2(x4, tile_t=128, tile_c=128))
    assert y4.shape == (2, 256, 600)
    assert jnp.array_equal(y4, jnp.swapaxes(x4, 1, 2)), "ragged-T mismatch"

    # 6) bf16 (packed dtype) on the contiguous-write tiled path.
    x5 = jax.random.normal(ks[5], (2, 256, 640), dtype=jnp.float32).astype(
        jnp.bfloat16)
    y5 = jax.block_until_ready(
        pallas_transpose_1_2(x5, small_plane_bytes=0))
    assert y5.shape == (2, 640, 256) and y5.dtype == x5.dtype
    assert jnp.array_equal(y5, jnp.swapaxes(x5, 1, 2)), "bf16 mismatch"

    print("KERNEL_OK")
</pallas_src>

<mosaic_0001>
module attributes {stable_mosaic.version = 11 : i64} {
  func.func @_transpose3d_kernel(%arg0: i32, %arg1: memref<64x8x32xf32, #tpu.memory_space<vmem>>, %arg2: memref<64x32x8xf32, #tpu.memory_space<vmem>>) attributes {dimension_semantics = [#tpu.dimension_semantics<parallel>], iteration_bounds = array<i64: 1>, scalar_prefetch = 0 : i64, scratch_operands = 0 : i64, tpu.core_type = #tpu.core_type<tc>, window_params = [{transform_indices = @transform_0, window_bounds = array<i64: 64, 8, 32>}, {transform_indices = @transform_1, window_bounds = array<i64: 64, 32, 8>}]} {
    %c0 = arith.constant 0 : index
    %c0_0 = arith.constant 0 : index
    %c0_1 = arith.constant 0 : index
    %0 = vector.load %arg1[%c0, %c0_0, %c0_1] : memref<64x8x32xf32, #tpu.memory_space<vmem>>, vector<64x8x32xf32>
    %1 = tpu.transpose %0, [0, 2, 1] : vector<64x8x32xf32> -> vector<64x32x8xf32>
    %c0_2 = arith.constant 0 : index
    %c0_3 = arith.constant 0 : index
    %c0_4 = arith.constant 0 : index
    %2 = vector.load %arg2[%c0_2, %c0_3, %c0_4] : memref<64x32x8xf32, #tpu.memory_space<vmem>>, vector<64x32x8xf32>
    tpu.vector_store %arg2[%c0_2, %c0_3, %c0_4], %1 {strides = array<i32>} : memref<64x32x8xf32, #tpu.memory_space<vmem>>, vector<64x32x8xf32>,
    return
  }
  func.func @transform_0(%arg0: i32) -> (i32, i32, i32) {
    %c0_i32 = arith.constant 0 : i32
    %c0_i32_0 = arith.constant 0 : i32
    %c0_i32_1 = arith.constant 0 : i32
    return %arg0, %c0_i32, %c0_i32_0 : i32, i32, i32
  }
  func.func @transform_1(%arg0: i32) -> (i32, i32, i32) {
    %c0_i32 = arith.constant 0 : i32
    %c0_i32_0 = arith.constant 0 : i32
    %c0_i32_1 = arith.constant 0 : i32
    return %arg0, %c0_i32, %c0_i32_0 : i32, i32, i32
  }
}

</mosaic_0001>

<bundles_post_ra>
// kernel: tpu_custom_call.1
= control target key start
LH: loop header
LB: loop body
LE: loop exit
PB: predicated region body
PF: predicated region fallthrough
CT: control target
= control target key end

     0   :  { %vm2120_vm0 = vcmask 64512   ;;  %s3608_s0 = inlined_call_operand.vmem [shape: f32[64,8,32], index: 0, kind: input, shape index: {}]   ;;  %s3609_s1 = inlined_call_operand.vmem [shape: f32[64,32,8], index: 1, kind: output, shape index: {}]  }
   0x1   :  { %v10_v0 = vld [vmem:[%s3608_s0 + $0x10] sm:$0xff]  ;;  %v8_v1 = vld [vmem:[%s3608_s0] sm:$0xff]  ;;  %v11_v2 = vld [vmem:[%s3608_s0 + $0x18] sm:$0xff] }
   0x2   :  { %136 = vxpose.xlu1.b32.start.end [1/1] (short) (narrow) %v10_v0, 32  ;;  %72 = vxpose.xlu0.b32.start.end [1/1] (short) (narrow) %v8_v1, 32  ;;  %v9_v3 = vld [vmem:[%s3608_s0 + $0x8] sm:$0xff]  ;;  %v12_v5 = vld [vmem:[%s3608_s0 + $0x20] sm:$0xff]  ;;  %v15_v6 = vld [vmem:[%s3608_s0 + $0x38] sm:$0xff] }
   0x3   :  { %v13_v4 = vld [vmem:[%s3608_s0 + $0x28] sm:$0xff]  ;;  %v14_v7 = vld [vmem:[%s3608_s0 + $0x30] sm:$0xff]  ;;  %v16_v9 = vld [vmem:[%s3608_s0 + $0x40] sm:$0xff] }
   0x4   :  { %v17_v8 = vld [vmem:[%s3608_s0 + $0x48] sm:$0xff]  ;;  %v19_v10 = vld [vmem:[%s3608_s0 + $0x58] sm:$0xff]  ;;  %v18_v11 = vld [vmem:[%s3608_s0 + $0x50] sm:$0xff] }
   0x5   :  { %v21_v12 = vld [vmem:[%s3608_s0 + $0x68] sm:$0xff]  ;;  %v20_v13 = vld [vmem:[%s3608_s0 + $0x60] sm:$0xff]  ;;  %v23_v14 = vld [vmem:[%s3608_s0 + $0x78] sm:$0xff] }
   0x6   :  { %v22_v15 = vld [vmem:[%s3608_s0 + $0x70] sm:$0xff]  ;;  %v25_v16 = vld [vmem:[%s3608_s0 + $0x88] sm:$0xff]  ;;  %v24_v17 = vld [vmem:[%s3608_s0 + $0x80] sm:$0xff] }
   0x7   :  { %v27_v18 = vld [vmem:[%s3608_s0 + $0x98] sm:$0xff]  ;;  %v26_v19 = vld [vmem:[%s3608_s0 + $0x90] sm:$0xff]  ;;  %v29_v20 = vld [vmem:[%s3608_s0 + $0xa8] sm:$0xff] }
   0x8   :  { %v28_v21 = vld [vmem:[%s3608_s0 + $0xa0] sm:$0xff]  ;;  %v31_v30 = vld [vmem:[%s3608_s0 + $0xb8] sm:$0xff]  ;;  %v30_v31 = vld [vmem:[%s3608_s0 + $0xb0] sm:$0xff] }
   0x9   :  { %v33_v38 = vld [vmem:[%s3608_s0 + $0xc8] sm:$0xff]  ;;  %v32_v39 = vld [vmem:[%s3608_s0 + $0xc0] sm:$0xff]  ;;  %v35_v46 = vld [vmem:[%s3608_s0 + $0xd8] sm:$0xff] }
   0xa   :  { %v34_v47 = vld [vmem:[%s3608_s0 + $0xd0] sm:$0xff]  ;;  %v37_v54 = vld [vmem:[%s3608_s0 + $0xe8] sm:$0xff]  ;;  %v36_v55 = vld [vmem:[%s3608_s0 + $0xe0] sm:$0xff] }
   0xb   :  { %v39_v0 = vld [vmem:[%s3608_s0 + $0xf8] sm:$0xff]  ;;  %v38_v1 = vld [vmem:[%s3608_s0 + $0xf0] sm:$0xff] }
   0xf   :  { %168 = vxpose.xlu1.b32.start.end [1/1] (short) (narrow) %v11_v2, 32  ;;  %104 = vxpose.xlu0.b32.start.end [1/1] (short) (narrow) %v9_v3, 32 }
  0x1c   :  { %232 = vxpose.xlu1.b32.start.end [1/1] (short) (narrow) %v13_v4, 32  ;;  %200 = vxpose.xlu0.b32.start.end [1/1] (short) (narrow) %v12_v5, 32 }
  0x29   :  { %296 = vxpose.xlu1.b32.start.end [1/1] (short) (narrow) %v15_v6, 32  ;;  %264 = vxpose.xlu0.b32.start.end [1/1] (short) (narrow) %v14_v7, 32 }
  0x36   :  { %360 = vxpose.xlu1.b32.start.end [1/1] (short) (narrow) %v17_v8, 32  ;;  %328 = vxpose.xlu0.b32.start.end [1/1] (short) (narrow) %v16_v9, 32  ;;  %v41_v8 = vld [vmem:[%s3608_s0 + $0x108] sm:$0xff]  ;;  %v40_v9 = vld [vmem:[%s3608_s0 + $0x100] sm:$0xff] }
  0x43   :  { %424 = vxpose.xlu1.b32.start.end [1/1] (short) (narrow) %v19_v10, 32  ;;  %392 = vxpose.xlu0.b32.start.end [1/1] (short) (narrow) %v18_v11, 32 }
  0x50   :  { %488 = vxpose.xlu1.b32.start.end [1/1] (short) (narrow) %v21_v12, 32  ;;  %456 = vxpose.xlu0.b32.start.end [1/1] (short) (narrow) %v20_v13, 32 }
  0x5d   :  { %552 = vxpose.xlu1.b32.start.end [1/1] (short) (narrow) %v23_v14, 32  ;;  %520 = vxpose.xlu0.b32.start.end [1/1] (short) (narrow) %v22_v15, 32 }
  0x6a   :  { %616 = vxpose.xlu1.b32.start.end [1/1] (short) (narrow) %v25_v16, 32  ;;  %584 = vxpose.xlu0.b32.start.end [1/1] (short) (narrow) %v24_v17, 32  ;;  %v43_v16 = vld [vmem:[%s3608_s0 + $0x118] sm:$0xff]  ;;  %v42_v17 = vld [vmem:[%s3608_s0 + $0x110] sm:$0xff] }
  0x77   :  { %680 = vxpose.xlu1.b32.start.end [1/1] (short) (narrow) %v27_v18, 32  ;;  %648 = vxpose.xlu0.b32.start.end [1/1] (short) (narrow) %v26_v19, 32 }
  0x82   :  { %v152_v22 = vpop.trf.xlu1  ;;  %v88_v23 = vpop.trf.xlu0 }
  0x83   :  { %2129 = vst.msk [vmem:[%s3609_s1 + $0x40] sm:$0xff] %vm2120_vm0, %v152_v22  ;;  %2121 = vst.msk [vmem:[%s3609_s1] sm:$0xff] %vm2120_vm0, %v88_v23 }
  0x84   :  { %744 = vxpose.xlu1.b32.start.end [1/1] (short) (narrow) %v29_v20, 32  ;;  %712 = vxpose.xlu0.b32.start.end [1/1] (short) (narrow) %v28_v21, 32 }
  0x86   :  { %v153_v24 = vpop.trf.xlu1  ;;  %v89_v25 = vpop.trf.xlu0 }
  0x87   :  { %2130 = vst.msk [vmem:[%s3609_s1 + $0x48] sm:$0xff] %vm2120_vm0, %v153_v24  ;;  %2122 = vst.msk [vmem:[%s3609_s1 + $0x8] sm:$0xff] %vm2120_vm0, %v89_v25  ;;  %v45_v24 = vld [vmem:[%s3608_s0 + $0x128] sm:$0xff]  ;;  %v44_v25 = vld [vmem:[%s3608_s0 + $0x120] sm:$0xff] }
  0x8a   :  { %v154_v26 = vpop.trf.xlu1  ;;  %v90_v27 = vpop.trf.xlu0 }
  0x8b   :  { %2131 = vst.msk [vmem:[%s3609_s1 + $0x50] sm:$0xff] %vm2120_vm0, %v154_v26  ;;  %2123 = vst.msk [vmem:[%s3609_s1 + $0x10] sm:$0xff] %vm2120_vm0, %v90_v27 }
  0x8e   :  { %v155_v28 = vpop.trf.xlu1  ;;  %v91_v29 = vpop.trf.xlu0 }
  0x8f   :  { %2132 = vst.msk [vmem:[%s3609_s1 + $0x58] sm:$0xff] %vm2120_vm0, %v155_v28  ;;  %2124 = vst.msk [vmem:[%s3609_s1 + $0x18] sm:$0xff] %vm2120_vm0, %v91_v29 }
  0x91   :  { %808 = vxpose.xlu1.b32.start.end [1/1] (short) (narrow) %v31_v30, 32  ;;  %776 = vxpose.xlu0.b32.start.end [1/1] (short) (narrow) %v30_v31, 32 }
  0x92   :  { %v184_v32 = vpop.trf.xlu1  ;;  %v120_v33 = vpop.trf.xlu0 }
  0x93   :  { %2133 = vst.msk [vmem:[%s3609_s1 + $0x60] sm:$0xff] %vm2120_vm0, %v184_v32  ;;  %2125 = vst.msk [vmem:[%s3609_s1 + $0x20] sm:$0xff] %vm2120_vm0, %v120_v33 }
  0x96   :  { %v185_v34 = vpop.trf.xlu1  ;;  %v121_v35 = vpop.trf.xlu0 }
  0x97   :  { %2134 = vst.msk [vmem:[%s3609_s1 + $0x68] sm:$0xff] %vm2120_vm0, %v185_v34  ;;  %2126 = vst.msk [vmem:[%s3609_s1 + $0x28] sm:$0xff] %vm2120_vm0, %v121_v35  ;;  %v47_v34 = vld [vmem:[%s3608_s0 + $0x138] sm:$0xff]  ;;  %v46_v35 = vld [vmem:[%s3608_s0 + $0x130] sm:$0xff] }
  0x9a   :  { %v186_v36 = vpop.trf.xlu1  ;;  %v122_v37 = vpop.trf.xlu0 }
  0x9b   :  { %2135 = vst.msk [vmem:[%s3609_s1 + $0x70] sm:$0xff] %vm2120_vm0, %v186_v36  ;;  %2127 = vst.msk [vmem:[%s3609_s1 + $0x30] sm:$0xff] %vm2120_vm0, %v122_v37 }
  0x9e   :  { %v187_v40 = vpop.trf.xlu1  ;;  %v123_v41 = vpop.trf.xlu0  ;;  %872 = vxpose.xlu1.b32.start.end [1/1] (short) (narrow) %v33_v38, 32  ;;  %840 = vxpose.xlu0.b32.start.end [1/1] (short) (narrow) %v32_v39, 32 }
  0x9f   :  { %2136 = vst.msk [vmem:[%s3609_s1 + $0x78] sm:$0xff] %vm2120_vm0, %v187_v40  ;;  %2128 = vst.msk [vmem:[%s3609_s1 + $0x38] sm:$0xff] %vm2120_vm0, %v123_v41 }
  0xa2   :  { %v248_v42 = vpop.trf.xlu1  ;;  %v216_v43 = vpop.trf.xlu0 }
  0xa3   :  { %2141 = vst.msk [vmem:[%s3609_s1 + $0xa0] sm:$0xff] %vm2120_vm0, %v248_v42  ;;  %2137 = vst.msk [vmem:[%s3609_s1 + $0x80] sm:$0xff] %vm2120_vm0, %v216_v43 }
  0xa6   :  { %v249_v44 = vpop.trf.xlu1  ;;  %v217_v45 = vpop.trf.xlu0 }
  0xa7   :  { %2142 = vst.msk [vmem:[%s3609_s1 + $0xa8] sm:$0xff] %vm2120_vm0, %v249_v44  ;;  %2138 = vst.msk [vmem:[%s3609_s1 + $0x88] sm:$0xff] %vm2120_vm0, %v217_v45  ;;  %v49_v44 = vld [vmem:[%s3608_s0 + $0x148] sm:$0xff]  ;;  %v48_v45 = vld [vmem:[%s3608_s0 + $0x140] sm:$0xff] }
  0xaa   :  { %v250_v48 = vpop.trf.xlu1  ;;  %v218_v49 = vpop.trf.xlu0 }
  0xab   :  { %2143 = vst.msk [vmem:[%s3609_s1 + $0xb0] sm:$0xff] %vm2120_vm0, %v250_v48  ;;  %2139 = vst.msk [vmem:[%s3609_s1 + $0x90] sm:$0xff] %vm2120_vm0, %v218_v49  ;;  %936 = vxpose.xlu1.b32.start.end [1/1] (short) (narrow) %v35_v46, 32  ;;  %904 = vxpose.xlu0.b32.start.end [1/1] (short) (narrow) %v34_v47, 32 }
  0xae   :  { %v251_v50 = vpop.trf.xlu1  ;;  %v219_v51 = vpop.trf.xlu0 }
  0xaf   :  { %2144 = vst.msk [vmem:[%s3609_s1 + $0xb8] sm:$0xff] %vm2120_vm0, %v251_v50  ;;  %2140 = vst.msk [vmem:[%s3609_s1 + $0x98] sm:$0xff] %vm2120_vm0, %v219_v51 }
  0xb2   :  { %v312_v52 = vpop.trf.xlu1  ;;  %v280_v53 = vpop.trf.xlu0 }
  0xb3   :  { %2149 = vst.msk [vmem:[%s3609_s1 + $0xe0] sm:$0xff] %vm2120_vm0, %v312_v52  ;;  %2145 = vst.msk [vmem:[%s3609_s1 + $0xc0] sm:$0xff] %vm2120_vm0, %v280_v53 }
  0xb6   :  { %v313_v56 = vpop.trf.xlu1  ;;  %v281_v57 = vpop.trf.xlu0 }
  0xb7   :  { %2150 = vst.msk [vmem:[%s3609_s1 + $0xe8] sm:$0xff] %vm2120_vm0, %v313_v56  ;;  %2146 = vst.msk [vmem:[%s3609_s1 + $0xc8] sm:$0xff] %vm2120_vm0, %v281_v57 }
  0xb8   :  { %1000 = vxpose.xlu1.b32.start.end [1/1] (short) (narrow) %v37_v54, 32  ;;  %968 = vxpose.xlu0.b32.start.end [1/1] (short) (narrow) %v36_v55, 32  ;;  %v51_v54 = vld [vmem:[%s3608_s0 + $0x158] sm:$0xff]  ;;  %v50_v55 = vld [vmem:[%s3608_s0 + $0x150] sm:$0xff] }
  0xba   :  { %v314_v58 = vpop.trf.xlu1  ;;  %v282_v59 = vpop.trf.xlu0 }
  0xbb   :  { %2151 = vst.msk [vmem:[%s3609_s1 + $0xf0] sm:$0xff] %vm2120_vm0, %v314_v58  ;;  %2147 = vst.msk [vmem:[%s3609_s1 + $0xd0] sm:$0xff] %vm2120_vm0, %v282_v59 }
  0xbe   :  { %v315_v60 = vpop.trf.xlu1  ;;  %v283_v61 = vpop.trf.xlu0 }
  0xbf   :  { %2152 = vst.msk [vmem:[%s3609_s1 + $0xf8] sm:$0xff] %vm2120_vm0, %v315_v60  ;;  %2148 = vst.msk [vmem:[%s3609_s1 + $0xd8] sm:$0xff] %vm2120_vm0, %v283_v61 }
  0xc2   :  { %v376_v62 = vpop.trf.xlu1  ;;  %v344_v63 = vpop.trf.xlu0 }
  0xc3   :  { %2157 = vst.msk [vmem:[%s3609_s1 + $0x120] sm:$0xff] %vm2120_vm0, %v376_v62  ;;  %2153 = vst.msk [vmem:[%s3609_s1 + $0x100] sm:$0xff] %vm2120_vm0, %v344_v63 }
  0xc5   :  { %1064 = vxpose.xlu1.b32.start.end [1/1] (short) (narrow) %v39_v0, 32  ;;  %1032 = vxpose.xlu0.b32.start.end [1/1] (short) (narrow) %v38_v1, 32  ;;  %v53_v0 = vld [vmem:[%s3608_s0 + $0x168] sm:$0xff]  ;;  %v52_v1 = vld [vmem:[%s3608_s0 + $0x160] sm:$0xff] }
  0xc6   :  { %v377_v2 = vpop.trf.xlu1  ;;  %v345_v3 = vpop.trf.xlu0 }
  0xc7   :  { %2158 = vst.msk [vmem:[%s3609_s1 + $0x128] sm:$0xff] %vm2120_vm0, %v377_v2  ;;  %2154 = vst.msk [vmem:[%s3609_s1 + $0x108] sm:$0xff] %vm2120_vm0, %v345_v3 }
  0xca   :  { %v378_v4 = vpop.trf.xlu1  ;;  %v346_v5 = vpop.trf.xlu0 }
  0xcb   :  { %2159 = vst.msk [vmem:[%s3609_s1 + $0x130] sm:$0xff] %vm2120_vm0, %v378_v4  ;;  %2155 = vst.msk [vmem:[%s3609_s1 + $0x110] sm:$0xff] %vm2120_vm0, %v346_v5 }
  0xce   :  { %v379_v6 = vpop.trf.xlu1  ;;  %v347_v7 = vpop.trf.xlu0 }
  0xcf   :  { %2160 = vst.msk [vmem:[%s3609_s1 + $0x138] sm:$0xff] %vm2120_vm0, %v379_v6  ;;  %2156 = vst.msk [vmem:[%s3609_s1 + $0x118] sm:$0xff] %vm2120_vm0, %v347_v7 }
  0xd2   :  { %v440_v10 = vpop.trf.xlu1  ;;  %v408_v11 = vpop.trf.xlu0  ;;  %1128 = vxpose.xlu1.b32.start.end [1/1] (short) (narrow) %v41_v8, 32  ;;  %1096 = vxpose.xlu0.b32.start.end [1/1] (short) (narrow) %v40_v9, 32 }
  0xd3   :  { %2165 = vst.msk [vmem:[%s3609_s1 + $0x160] sm:$0xff] %vm2120_vm0, %v440_v10  ;;  %2161 = vst.msk [vmem:[%s3609_s1 + $0x140] sm:$0xff] %vm2120_vm0, %v408_v11  ;;  %v55_v10 = vld [vmem:[%s3608_s0 + $0x178] sm:$0xff]  ;;  %v54_v11 = vld [vmem:[%s3608_s0 + $0x170] sm:$0xff] }
  0xd6   :  { %v441_v12 = vpop.trf.xlu1  ;;  %v409_v13 = vpop.trf.xlu0 }
  0xd7   :  { %2166 = vst.msk [vmem:[%s3609_s1 + $0x168] sm:$0xff] %vm2120_vm0, %v441_v12  ;;  %2162 = vst.msk [vmem:[%s3609_s1 + $0x148] sm:$0xff] %vm2120_vm0, %v409_v13 }
  0xda   :  { %v442_v14 = vpop.trf.xlu1  ;;  %v410_v15 = vpop.trf.xlu0 }
  0xdb   :  { %2167 = vst.msk [vmem:[%s3609_s1 + $0x170] sm:$0xff] %vm2120_vm0, %v442_v14  ;;  %2163 = vst.msk [vmem:[%s3609_s1 + $0x150] sm:$0xff] %vm2120_vm0, %v410_v15 }
  0xde   :  { %v443_v18 = vpop.trf.xlu1  ;;  %v411_v19 = vpop.trf.xlu0 }
  0xdf   :  { %2168 = vst.msk [vmem:[%s3609_s1 + $0x178] sm:$0xff] %vm2120_vm0, %v443_v18  ;;  %2164 = vst.msk [vmem:[%s3609_s1 + $0x158] sm:$0xff] %vm2120_vm0, %v411_v19  ;;  %1192 = vxpose.xlu1.b32.start.end [1/1] (short) (narrow) %v43_v16, 32  ;;  %1160 = vxpose.xlu0.b32.start.end [1/1] (short) (narrow) %v42_v17, 32 }
  0xe2   :  { %v504_v20 = vpop.trf.xlu1  ;;  %v472_v21 = vpop.trf.xlu0 }
  0xe3   :  { %2173 = vst.msk [vmem:[%s3609_s1 + $0x1a0] sm:$0xff] %vm2120_vm0, %v504_v20  ;;  %2169 = vst.msk [vmem:[%s3609_s1 + $0x180] sm:$0xff] %vm2120_vm0, %v472_v21  ;;  %v57_v20 = vld [vmem:[%s3608_s0 + $0x188] sm:$0xff]  ;;  %v56_v21 = vld [vmem:[%s3608_s0 + $0x180] sm:$0xff] }
  0xe6   :  { %v505_v22 = vpop.trf.xlu1  ;;  %v473_v23 = vpop.trf.xlu0 }
  0xe7   :  { %2174 = vst.msk [vmem:[%s3609_s1 + $0x1a8] sm:$0xff] %vm2120_vm0, %v505_v22  ;;  %2170 = vst.msk [vmem:[%s3609_s1 + $0x188] sm:$0xff] %vm2120_vm0, %v473_v23 }
  0xea   :  { %v506_v26 = vpop.trf.xlu1  ;;  %v474_v27 = vpop.trf.xlu0 }
  0xeb   :  { %2175 = vst.msk [vmem:[%s3609_s1 + $0x1b0] sm:$0xff] %vm2120_vm0, %v506_v26  ;;  %2171 = vst.msk [vmem:[%s3609_s1 + $0x190] sm:$0xff] %vm2120_vm0, %v474_v27 }
  0xec   :  { %1256 = vxpose.xlu1.b32.start.end [1/1] (short) (narrow) %v45_v24, 32  ;;  %1224 = vxpose.xlu0.b32.start.end [1/1] (short) (narrow) %v44_v25, 32 }
  0xee   :  { %v507_v28 = vpop.trf.xlu1  ;;  %v475_v29 = vpop.trf.xlu0 }
  0xef   :  { %2176 = vst.msk [vmem:[%s3609_s1 + $0x1b8] sm:$0xff] %vm2120_vm0, %v507_v28  ;;  %2172 = vst.msk [vmem:[%s3609_s1 + $0x198] sm:$0xff] %vm2120_vm0, %v475_v29 }
  0xf2   :  { %v568_v30 = vpop.trf.xlu1  ;;  %v536_v31 = vpop.trf.xlu0 }
  0xf3   :  { %2181 = vst.msk [vmem:[%s3609_s1 + $0x1e0] sm:$0xff] %vm2120_vm0, %v568_v30  ;;  %2177 = vst.msk [vmem:[%s3609_s1 + $0x1c0] sm:$0xff] %vm2120_vm0, %v536_v31  ;;  %v59_v30 = vld [vmem:[%s3608_s0 + $0x198] sm:$0xff]  ;;  %v58_v31 = vld [vmem:[%s3608_s0 + $0x190] sm:$0xff] }
  0xf6   :  { %v569_v32 = vpop.trf.xlu1  ;;  %v537_v33 = vpop.trf.xlu0 }
  0xf7   :  { %2182 = vst.msk [vmem:[%s3609_s1 + $0x1e8] sm:$0xff] %vm2120_vm0, %v569_v32  ;;  %2178 = vst.msk [vmem:[%s3609_s1 + $0x1c8] sm:$0xff] %vm2120_vm0, %v537_v33 }
  0xfa   :  { %v570_v36 = vpop.trf.xlu1  ;;  %v538_v37 = vpop.trf.xlu0  ;;  %1320 = vxpose.xlu1.b32.start.end [1/1] (short) (narrow) %v47_v34, 32  ;;  %1288 = vxpose.xlu0.b32.start.end [1/1] (short) (narrow) %v46_v35, 32 }
  0xfb   :  { %2183 = vst.msk [vmem:[%s3609_s1 + $0x1f0] sm:$0xff] %vm2120_vm0, %v570_v36  ;;  %2179 = vst.msk [vmem:[%s3609_s1 + $0x1d0] sm:$0xff] %vm2120_vm0, %v538_v37 }
  0xfe   :  { %v571_v38 = vpop.trf.xlu1  ;;  %v539_v39 = vpop.trf.xlu0 }
  0xff   :  { %2184 = vst.msk [vmem:[%s3609_s1 + $0x1f8] sm:$0xff] %vm2120_vm0, %v571_v38  ;;  %2180 = vst.msk [vmem:[%s3609_s1 + $0x1d8] sm:$0xff] %vm2120_vm0, %v539_v39 }
 0x102   :  { %v632_v40 = vpop.trf.xlu1  ;;  %v600_v41 = vpop.trf.xlu0 }
 0x103   :  { %2189 = vst.msk [vmem:[%s3609_s1 + $0x220] sm:$0xff] %vm2120_vm0, %v632_v40  ;;  %2185 = vst.msk [vmem:[%s3609_s1 + $0x200] sm:$0xff] %vm2120_vm0, %v600_v41  ;;  %v61_v40 = vld [vmem:[%s3608_s0 + $0x1a8] sm:$0xff]  ;;  %v60_v41 = vld [vmem:[%s3608_s0 + $0x1a0] sm:$0xff] }
 0x106   :  { %v633_v42 = vpop.trf.xlu1  ;;  %v601_v43 = vpop.trf.xlu0 }
 0x107   :  { %2190 = vst.msk [vmem:[%s3609_s1 + $0x228] sm:$0xff] %vm2120_vm0, %v633_v42  ;;  %2186 = vst.msk [vmem:[%s3609_s1 + $0x208] sm:$0xff] %vm2120_vm0, %v601_v43 }
 0x10a   :  { %v634_v46 = vpop.trf.xlu1  ;;  %v602_v47 = vpop.trf.xlu0  ;;  %1384 = vxpose.xlu1.b32.start.end [1/1] (short) (narrow) %v49_v44, 32  ;;  %1352 = vxpose.xlu0.b32.start.end [1/1] (short) (narrow) %v48_v45, 32 }
 0x10b   :  { %2191 = vst.msk [vmem:[%s3609_s1 + $0x230] sm:$0xff] %vm2120_vm0, %v634_v46  ;;  %2187 = vst.msk [vmem:[%s3609_s1 + $0x210] sm:$0xff] %vm2120_vm0, %v602_v47 }
 0x10e   :  { %v635_v48 = vpop.trf.xlu1  ;;  %v603_v49 = vpop.trf.xlu0 }
 0x10f   :  { %2192 = vst.msk [vmem:[%s3609_s1 + $0x238] sm:$0xff] %vm2120_vm0, %v635_v48  ;;  %2188 = vst.msk [vmem:[%s3609_s1 + $0x218] sm:$0xff] %vm2120_vm0, %v603_v49 }
 0x112   :  { %v696_v50 = vpop.trf.xlu1  ;;  %v664_v51 = vpop.trf.xlu0 }
 0x113   :  { %2197 = vst.msk [vmem:[%s3609_s1 + $0x260] sm:$0xff] %vm2120_vm0, %v696_v50  ;;  %2193 = vst.msk [vmem:[%s3609_s1 + $0x240] sm:$0xff] %vm2120_vm0, %v664_v51  ;;  %v63_v50 = vld [vmem:[%s3608_s0 + $0x1b8] sm:$0xff]  ;;  %v62_v51 = vld [vmem:[%s3608_s0 + $0x1b0] sm:$0xff] }
 0x116   :  { %v697_v52 = vpop.trf.xlu1  ;;  %v665_v53 = vpop.trf.xlu0 }
 0x117   :  { %2198 = vst.msk [vmem:[%s3609_s1 + $0x268] sm:$0xff] %vm2120_vm0, %v697_v52  ;;  %2194 = vst.msk [vmem:[%s3609_s1 + $0x248] sm:$0xff] %vm2120_vm0, %v665_v53 }
 0x11a   :  { %v698_v56 = vpop.trf.xlu1  ;;  %v666_v57 = vpop.trf.xlu0  ;;  %1448 = vxpose.xlu1.b32.start.end [1/1] (short) (narrow) %v51_v54, 32  ;;  %1416 = vxpose.xlu0.b32.start.end [1/1] (short) (narrow) %v50_v55, 32 }
 0x11b   :  { %2199 = vst.msk [vmem:[%s3609_s1 + $0x270] sm:$0xff] %vm2120_vm0, %v698_v56  ;;  %2195 = vst.msk [vmem:[%s3609_s1 + $0x250] sm:$0xff] %vm2120_vm0, %v666_v57 }
 0x11e   :  { %v699_v58 = vpop.trf.xlu1  ;;  %v667_v59 = vpop.trf.xlu0 }
 0x11f   :  { %2200 = vst.msk [vmem:[%s3609_s1 + $0x278] sm:$0xff] %vm2120_vm0, %v699_v58  ;;  %2196 = vst.msk [vmem:[%s3609_s1 + $0x258] sm:$0xff] %vm2120_vm0, %v667_v59 }
 0x122   :  { %v760_v60 = vpop.trf.xlu1  ;;  %v728_v61 = vpop.trf.xlu0 }
 0x123   :  { %2205 = vst.msk [vmem:[%s3609_s1 + $0x2a0] sm:$0xff] %vm2120_vm0, %v760_v60  ;;  %2201 = vst.msk [vmem:[%s3609_s1 + $0x280] sm:$0xff] %vm2120_vm0, %v728_v61  ;;  %v65_v60 = vld [vmem:[%s3608_s0 + $0x1c8] sm:$0xff]  ;;  %v64_v61 = vld [vmem:[%s3608_s0 + $0x1c0] sm:$0xff] }
 0x126   :  { %v761_v62 = vpop.trf.xlu1  ;;  %v729_v63 = vpop.trf.xlu0 }
 0x127   :  { %2206 = vst.msk [vmem:[%s3609_s1 + $0x2a8] sm:$0xff] %vm2120_vm0, %v761_v62  ;;  %2202 = vst.msk [vmem:[%s3609_s1 + $0x288] sm:$0xff] %vm2120_vm0, %v729_v63 }
 0x12a   :  { %v762_v2 = vpop.trf.xlu1  ;;  %v730_v3 = vpop.trf.xlu0  ;;  %1512 = vxpose.xlu1.b32.start.end [1/1] (short) (narrow) %v53_v0, 32  ;;  %1480 = vxpose.xlu0.b32.start.end [1/1] (short) (narrow) %v52_v1, 32 }
 0x12b   :  { %2207 = vst.msk [vmem:[%s3609_s1 + $0x2b0] sm:$0xff] %vm2120_vm0, %v762_v2  ;;  %2203 = vst.msk [vmem:[%s3609_s1 + $0x290] sm:$0xff] %vm2120_vm0, %v730_v3 }
 0x12e   :  { %v763_v4 = vpop.trf.xlu1  ;;  %v731_v5 = vpop.trf.xlu0 }
 0x12f   :  { %2208 = vst.msk [vmem:[%s3609_s1 + $0x2b8] sm:$0xff] %vm2120_vm0, %v763_v4  ;;  %2204 = vst.msk [vmem:[%s3609_s1 + $0x298] sm:$0xff] %vm2120_vm0, %v731_v5 }
 0x132   :  { %v824_v6 = vpop.trf.xlu1  ;;  %v792_v7 = vpop.trf.xlu0 }
 0x133   :  { %2213 = vst.msk [vmem:[%s3609_s1 + $0x2e0] sm:$0xff] %vm2120_vm0, %v824_v6  ;;  %2209 = vst.msk [vmem:[%s3609_s1 + $0x2c0] sm:$0xff] %vm2120_vm0, %v792_v7  ;;  %v67_v6 = vld [vmem:[%s3608_s0 + $0x1d8] sm:$0xff]  ;;  %v66_v7 = vld [vmem:[%s3608_s0 + $0x1d0] sm:$0xff] }
 0x136   :  { %v825_v8 = vpop.trf.xlu1  ;;  %v793_v9 = vpop.trf.xlu0 }
 0x137   :  { %2214 = vst.msk [vmem:[%s3609_s1 + $0x2e8] sm:$0xff] %vm2120_vm0, %v825_v8  ;;  %2210 = vst.msk [vmem:[%s3609_s1 + $0x2c8] sm:$0xff] %vm2120_vm0, %v793_v9 }
 0x13a   :  { %v826_v12 = vpop.trf.xlu1  ;;  %v794_v13 = vpop.trf.xlu0  ;;  %1576 = vxpose.xlu1.b32.start.end [1/1] (short) (narrow) %v55_v10, 32  ;;  %1544 = vxpose.xlu0.b32.start.end [1/1] (short) (narrow) %v54_v11, 32 }
 0x13b   :  { %2215 = vst.msk [vmem:[%s3609_s1 + $0x2f0] sm:$0xff] %vm2120_vm0, %v826_v12  ;;  %2211 = vst.msk [vmem:[%s3609_s1 + $0x2d0] sm:$0xff] %vm2120_vm0, %v794_v13 }
 0x13e   :  { %v827_v14 = vpop.trf.xlu1  ;;  %v795_v15 = vpop.trf.xlu0 }
 0x13f   :  { %2216 = vst.msk [vmem:[%s3609_s1 + $0x2f8] sm:$0xff] %vm2120_vm0, %v827_v14  ;;  %2212 = vst.msk [vmem:[%s3609_s1 + $0x2d8] sm:$0xff] %vm2120_vm0, %v795_v15 }
 0x142   :  { %v888_v16 = vpop.trf.xlu1  ;;  %v856_v17 = vpop.trf.xlu0 }
 0x143   :  { %2221 = vst.msk [vmem:[%s3609_s1 + $0x320] sm:$0xff] %vm2120_vm0, %v888_v16  ;;  %2217 = vst.msk [vmem:[%s3609_s1 + $0x300] sm:$0xff] %vm2120_vm0, %v856_v17  ;;  %v69_v16 = vld [vmem:[%s3608_s0 + $0x1e8] sm:$0xff]  ;;  %v68_v17 = vld [vmem:[%s3608_s0 + $0x1e0] sm:$0xff] }
 0x146   :  { %v889_v18 = vpop.trf.xlu1  ;;  %v857_v19 = vpop.trf.xlu0 }
 0x147   :  { %2222 = vst.msk [vmem:[%s3609_s1 + $0x328] sm:$0xff] %vm2120_vm0, %v889_v18  ;;  %2218 = vst.msk [vmem:[%s3609_s1 + $0x308] sm:$0xff] %vm2120_vm0, %v857_v19 }
 0x14a   :  { %v890_v22 = vpop.trf.xlu1  ;;  %v858_v23 = vpop.trf.xlu0  ;;  %1640 = vxpose.xlu1.b32.start.end [1/1] (short) (narrow) %v57_v20, 32  ;;  %1608 = vxpose.xlu0.b32.start.end [1/1] (short) (narrow) %v56_v21, 32 }
 0x14b   :  { %2223 = vst.msk [vmem:[%s3609_s1 + $0x330] sm:$0xff] %vm2120_vm0, %v890_v22  ;;  %2219 = vst.msk [vmem:[%s3609_s1 + $0x310] sm:$0xff] %vm2120_vm0, %v858_v23 }
 0x14e   :  { %v891_v24 = vpop.trf.xlu1  ;;  %v859_v25 = vpop.trf.xlu0 }
 0x14f   :  { %2224 = vst.msk [vmem:[%s3609_s1 + $0x338] sm:$0xff] %vm2120_vm0, %v891_v24  ;;  %2220 = vst.msk [vmem:[%s3609_s1 + $0x318] sm:$0xff] %vm2120_vm0, %v859_v25 }
 0x152   :  { %v952_v26 = vpop.trf.xlu1  ;;  %v920_v27 = vpop.trf.xlu0 }
 0x153   :  { %2229 = vst.msk [vmem:[%s3609_s1 + $0x360] sm:$0xff] %vm2120_vm0, %v952_v26  ;;  %2225 = vst.msk [vmem:[%s3609_s1 + $0x340] sm:$0xff] %vm2120_vm0, %v920_v27  ;;  %v71_v26 = vld [vmem:[%s3608_s0 + $0x1f8] sm:$0xff]  ;;  %v70_v27 = vld [vmem:[%s3608_s0 + $0x1f0] sm:$0xff] }
 0x156   :  { %v953_v28 = vpop.trf.xlu1  ;;  %v921_v29 = vpop.trf.xlu0 }
 0x157   :  { %2230 = vst.msk [vmem:[%s3609_s1 + $0x368] sm:$0xff] %vm2120_vm0, %v953_v28  ;;  %2226 = vst.msk [vmem:[%s3609_s1 + $0x348] sm:$0xff] %vm2120_vm0, %v921_v29 }
 0x15a   :  { %v954_v32 = vpop.trf.xlu1  ;;  %v922_v33 = vpop.trf.xlu0  ;;  %1704 = vxpose.xlu1.b32.start.end [1/1] (short) (narrow) %v59_v30, 32  ;;  %1672 = vxpose.xlu0.b32.start.end [1/1] (short) (narrow) %v58_v31, 32 }
 0x15b   :  { %2231 = vst.msk [vmem:[%s3609_s1 + $0x370] sm:$0xff] %vm2120_vm0, %v954_v32  ;;  %2227 = vst.msk [vmem:[%s3609_s1 + $0x350] sm:$0xff] %vm2120_vm0, %v922_v33 }
 0x15e   :  { %v955_v34 = vpop.trf.xlu1  ;;  %v923_v35 = vpop.trf.xlu0 }
 0x15f   :  { %2232 = vst.msk [vmem:[%s3609_s1 + $0x378] sm:$0xff] %vm2120_vm0, %v955_v34  ;;  %2228 = vst.msk [vmem:[%s3609_s1 + $0x358] sm:$0xff] %vm2120_vm0, %v923_v35 }
 0x162   :  { %v1016_v36 = vpop.trf.xlu1  ;;  %v984_v37 = vpop.trf.xlu0 }
 0x163   :  { %2237 = vst.msk [vmem:[%s3609_s1 + $0x3a0] sm:$0xff] %vm2120_vm0, %v1016_v36  ;;  %2233 = vst.msk [vmem:[%s3609_s1 + $0x380] sm:$0xff] %vm2120_vm0, %v984_v37 }
 0x166   :  { %v1017_v38 = vpop.trf.xlu1  ;;  %v985_v39 = vpop.trf.xlu0 }
 0x167   :  { %2238 = vst.msk [vmem:[%s3609_s1 + $0x3a8] sm:$0xff] %vm2120_vm0, %v1017_v38  ;;  %2234 = vst.msk [vmem:[%s3609_s1 + $0x388] sm:$0xff] %vm2120_vm0, %v985_v39 }
 0x16a   :  { %v1018_v42 = vpop.trf.xlu1  ;;  %v986_v43 = vpop.trf.xlu0  ;;  %1768 = vxpose.xlu1.b32.start.end [1/1] (short) (narrow) %v61_v40, 32  ;;  %1736 = vxpose.xlu0.b32.start.end [1/1] (short) (narrow) %v60_v41, 32 }
 0x16b   :  { %2239 = vst.msk [vmem:[%s3609_s1 + $0x3b0] sm:$0xff] %vm2120_vm0, %v1018_v42  ;;  %2235 = vst.msk [vmem:[%s3609_s1 + $0x390] sm:$0xff] %vm2120_vm0, %v986_v43 }
 0x16e   :  { %v1019_v44 = vpop.trf.xlu1  ;;  %v987_v45 = vpop.trf.xlu0 }
 0x16f   :  { %2240 = vst.msk [vmem:[%s3609_s1 + $0x3b8] sm:$0xff] %vm2120_vm0, %v1019_v44  ;;  %2236 = vst.msk [vmem:[%s3609_s1 + $0x398] sm:$0xff] %vm2120_vm0, %v987_v45 }
 0x172   :  { %v1080_v46 = vpop.trf.xlu1  ;;  %v1048_v47 = vpop.trf.xlu0 }
 0x173   :  { %2245 = vst.msk [vmem:[%s3609_s1 + $0x3e0] sm:$0xff] %vm2120_vm0, %v1080_v46  ;;  %2241 = vst.msk [vmem:[%s3609_s1 + $0x3c0] sm:$0xff] %vm2120_vm0, %v1048_v47 }
 0x176   :  { %v1081_v48 = vpop.trf.xlu1  ;;  %v1049_v49 = vpop.trf.xlu0 }
 0x177   :  { %2246 = vst.msk [vmem:[%s3609_s1 + $0x3e8] sm:$0xff] %vm2120_vm0, %v1081_v48  ;;  %2242 = vst.msk [vmem:[%s3609_s1 + $0x3c8] sm:$0xff] %vm2120_vm0, %v1049_v49 }
 0x17a   :  { %v1082_v52 = vpop.trf.xlu1  ;;  %v1050_v53 = vpop.trf.xlu0  ;;  %1832 = vxpose.xlu1.b32.start.end [1/1] (short) (narrow) %v63_v50, 32  ;;  %1800 = vxpose.xlu0.b32.start.end [1/1] (short) (narrow) %v62_v51, 32 }
 0x17b   :  { %2247 = vst.msk [vmem:[%s3609_s1 + $0x3f0] sm:$0xff] %vm2120_vm0, %v1082_v52  ;;  %2243 = vst.msk [vmem:[%s3609_s1 + $0x3d0] sm:$0xff] %vm2120_vm0, %v1050_v53 }
 0x17e   :  { %v1083_v54 = vpop.trf.xlu1  ;;  %v1051_v55 = vpop.trf.xlu0 }
 0x17f   :  { %2248 = vst.msk [vmem:[%s3609_s1 + $0x3f8] sm:$0xff] %vm2120_vm0, %v1083_v54  ;;  %2244 = vst.msk [vmem:[%s3609_s1 + $0x3d8] sm:$0xff] %vm2120_vm0, %v1051_v55 }
 0x182   :  { %v1144_v56 = vpop.trf.xlu1  ;;  %v1112_v57 = vpop.trf.xlu0 }
 0x183   :  { %2253 = vst.msk [vmem:[%s3609_s1 + $0x420] sm:$0xff] %vm2120_vm0, %v1144_v56  ;;  %2249 = vst.msk [vmem:[%s3609_s1 + $0x400] sm:$0xff] %vm2120_vm0, %v1112_v57 }
 0x186   :  { %v1145_v58 = vpop.trf.xlu1  ;;  %v1113_v59 = vpop.trf.xlu0 }
 0x187   :  { %2254 = vst.msk [vmem:[%s3609_s1 + $0x428] sm:$0xff] %vm2120_vm0, %v1145_v58  ;;  %2250 = vst.msk [vmem:[%s3609_s1 + $0x408] sm:$0xff] %vm2120_vm0, %v1113_v59 }
 0x18a   :  { %v1146_v62 = vpop.trf.xlu1  ;;  %v1114_v63 = vpop.trf.xlu0  ;;  %1896 = vxpose.xlu1.b32.start.end [1/1] (short) (narrow) %v65_v60, 32  ;;  %1864 = vxpose.xlu0.b32.start.end [1/1] (short) (narrow) %v64_v61, 32 }
 0x18b   :  { %2255 = vst.msk [vmem:[%s3609_s1 + $0x430] sm:$0xff] %vm2120_vm0, %v1146_v62  ;;  %2251 = vst.msk [vmem:[%s3609_s1 + $0x410] sm:$0xff] %vm2120_vm0, %v1114_v63 }
 0x18e   :  { %v1147_v0 = vpop.trf.xlu1  ;;  %v1115_v1 = vpop.trf.xlu0 }
 0x18f   :  { %2256 = vst.msk [vmem:[%s3609_s1 + $0x438] sm:$0xff] %vm2120_vm0, %v1147_v0  ;;  %2252 = vst.msk [vmem:[%s3609_s1 + $0x418] sm:$0xff] %vm2120_vm0, %v1115_v1 }
 0x192   :  { %v1208_v2 = vpop.trf.xlu1  ;;  %v1176_v3 = vpop.trf.xlu0 }
 0x193   :  { %2261 = vst.msk [vmem:[%s3609_s1 + $0x460] sm:$0xff] %vm2120_vm0, %v1208_v2  ;;  %2257 = vst.msk [vmem:[%s3609_s1 + $0x440] sm:$0xff] %vm2120_vm0, %v1176_v3 }
 0x196   :  { %v1209_v4 = vpop.trf.xlu1  ;;  %v1177_v5 = vpop.trf.xlu0 }
 0x197   :  { %2262 = vst.msk [vmem:[%s3609_s1 + $0x468] sm:$0xff] %vm2120_vm0, %v1209_v4  ;;  %2258 = vst.msk [vmem:[%s3609_s1 + $0x448] sm:$0xff] %vm2120_vm0, %v1177_v5 }
 0x19a   :  { %v1210_v8 = vpop.trf.xlu1  ;;  %v1178_v9 = vpop.trf.xlu0  ;;  %1960 = vxpose.xlu1.b32.start.end [1/1] (short) (narrow) %v67_v6, 32  ;;  %1928 = vxpose.xlu0.b32.start.end [1/1] (short) (narrow) %v66_v7, 32 }
 0x19b   :  { %2263 = vst.msk [vmem:[%s3609_s1 + $0x470] sm:$0xff] %vm2120_vm0, %v1210_v8  ;;  %2259 = vst.msk [vmem:[%s3609_s1 + $0x450] sm:$0xff] %vm2120_vm0, %v1178_v9 }
 0x19e   :  { %v1211_v10 = vpop.trf.xlu1  ;;  %v1179_v11 = vpop.trf.xlu0 }
 0x19f   :  { %2264 = vst.msk [vmem:[%s3609_s1 + $0x478] sm:$0xff] %vm2120_vm0, %v1211_v10  ;;  %2260 = vst.msk [vmem:[%s3609_s1 + $0x458] sm:$0xff] %vm2120_vm0, %v1179_v11 }
 0x1a2   :  { %v1272_v12 = vpop.trf.xlu1  ;;  %v1240_v13 = vpop.trf.xlu0 }
 0x1a3   :  { %2269 = vst.msk [vmem:[%s3609_s1 + $0x4a0] sm:$0xff] %vm2120_vm0, %v1272_v12  ;;  %2265 = vst.msk [vmem:[%s3609_s1 + $0x480] sm:$0xff] %vm2120_vm0, %v1240_v13 }
 0x1a6   :  { %v1273_v14 = vpop.trf.xlu1  ;;  %v1241_v15 = vpop.trf.xlu0 }
 0x1a7   :  { %2270 = vst.msk [vmem:[%s3609_s1 + $0x4a8] sm:$0xff] %vm2120_vm0, %v1273_v14  ;;  %2266 = vst.msk [vmem:[%s3609_s1 + $0x488] sm:$0xff] %vm2120_vm0, %v1241_v15 }
 0x1aa   :  { %v1274_v18 = vpop.trf.xlu1  ;;  %v1242_v19 = vpop.trf.xlu0  ;;  %2024 = vxpose.xlu1.b32.start.end [1/1] (short) (narrow) %v69_v16, 32  ;;  %1992 = vxpose.xlu0.b32.start.end [1/1] (short) (narrow) %v68_v17, 32 }
 0x1ab   :  { %2271 = vst.msk [vmem:[%s3609_s1 + $0x4b0] sm:$0xff] %vm2120_vm0, %v1274_v18  ;;  %2267 = vst.msk [vmem:[%s3609_s1 + $0x490] sm:$0xff] %vm2120_vm0, %v1242_v19 }
 0x1ae   :  { %v1275_v20 = vpop.trf.xlu1  ;;  %v1243_v21 = vpop.trf.xlu0 }
 0x1af   :  { %2272 = vst.msk [vmem:[%s3609_s1 + $0x4b8] sm:$0xff] %vm2120_vm0, %v1275_v20  ;;  %2268 = vst.msk [vmem:[%s3609_s1 + $0x498] sm:$0xff] %vm2120_vm0, %v1243_v21 }
 0x1b2   :  { %v1336_v22 = vpop.trf.xlu1  ;;  %v1304_v23 = vpop.trf.xlu0 }
 0x1b3   :  { %2277 = vst.msk [vmem:[%s3609_s1 + $0x4e0] sm:$0xff] %vm2120_vm0, %v1336_v22  ;;  %2273 = vst.msk [vmem:[%s3609_s1 + $0x4c0] sm:$0xff] %vm2120_vm0, %v1304_v23 }
 0x1b6   :  { %v1337_v24 = vpop.trf.xlu1  ;;  %v1305_v25 = vpop.trf.xlu0 }
 0x1b7   :  { %2278 = vst.msk [vmem:[%s3609_s1 + $0x4e8] sm:$0xff] %vm2120_vm0, %v1337_v24  ;;  %2274 = vst.msk [vmem:[%s3609_s1 + $0x4c8] sm:$0xff] %vm2120_vm0, %v1305_v25 }
 0x1ba   :  { %v1338_v28 = vpop.trf.xlu1  ;;  %v1306_v29 = vpop.trf.xlu0  ;;  %2088 = vxpose.xlu1.b32.start.end [1/1] (short) (narrow) %v71_v26, 32  ;;  %2056 = vxpose.xlu0.b32.start.end [1/1] (short) (narrow) %v70_v27, 32 }
 0x1bb   :  { %2279 = vst.msk [vmem:[%s3609_s1 + $0x4f0] sm:$0xff] %vm2120_vm0, %v1338_v28  ;;  %2275 = vst.msk [vmem:[%s3609_s1 + $0x4d0] sm:$0xff] %vm2120_vm0, %v1306_v29 }
 0x1be   :  { %v1339_v30 = vpop.trf.xlu1  ;;  %v1307_v31 = vpop.trf.xlu0 }
 0x1bf   :  { %2280 = vst.msk [vmem:[%s3609_s1 + $0x4f8] sm:$0xff] %vm2120_vm0, %v1339_v30  ;;  %2276 = vst.msk [vmem:[%s3609_s1 + $0x4d8] sm:$0xff] %vm2120_vm0, %v1307_v31 }
 0x1c2   :  { %v1400_v32 = vpop.trf.xlu1  ;;  %v1368_v33 = vpop.trf.xlu0 }
 0x1c3   :  { %2285 = vst.msk [vmem:[%s3609_s1 + $0x520] sm:$0xff] %vm2120_vm0, %v1400_v32  ;;  %2281 = vst.msk [vmem:[%s3609_s1 + $0x500] sm:$0xff] %vm2120_vm0, %v1368_v33 }
 0x1c6   :  { %v1401_v34 = vpop.trf.xlu1  ;;  %v1369_v35 = vpop.trf.xlu0 }
 0x1c7   :  { %2286 = vst.msk [vmem:[%s3609_s1 + $0x528] sm:$0xff] %vm2120_vm0, %v1401_v34  ;;  %2282 = vst.msk [vmem:[%s3609_s1 + $0x508] sm:$0xff] %vm2120_vm0, %v1369_v35 }
 0x1ca   :  { %v1402_v36 = vpop.trf.xlu1  ;;  %v1370_v37 = vpop.trf.xlu0 }
 0x1cb   :  { %2287 = vst.msk [vmem:[%s3609_s1 + $0x530] sm:$0xff] %vm2120_vm0, %v1402_v36  ;;  %2283 = vst.msk [vmem:[%s3609_s1 + $0x510] sm:$0xff] %vm2120_vm0, %v1370_v37 }
 0x1ce   :  { %v1403_v38 = vpop.trf.xlu1  ;;  %v1371_v39 = vpop.trf.xlu0 }
 0x1cf   :  { %2288 = vst.msk [vmem:[%s3609_s1 + $0x538] sm:$0xff] %vm2120_vm0, %v1403_v38  ;;  %2284 = vst.msk [vmem:[%s3609_s1 + $0x518] sm:$0xff] %vm2120_vm0, %v1371_v39 }
 0x1d2   :  { %v1464_v40 = vpop.trf.xlu1  ;;  %v1432_v41 = vpop.trf.xlu0 }
 0x1d3   :  { %2293 = vst.msk [vmem:[%s3609_s1 + $0x560] sm:$0xff] %vm2120_vm0, %v1464_v40  ;;  %2289 = vst.msk [vmem:[%s3609_s1 + $0x540] sm:$0xff] %vm2120_vm0, %v1432_v41 }
 0x1d6   :  { %v1465_v42 = vpop.trf.xlu1  ;;  %v1433_v43 = vpop.trf.xlu0 }
 0x1d7   :  { %2294 = vst.msk [vmem:[%s3609_s1 + $0x568] sm:$0xff] %vm2120_vm0, %v1465_v42  ;;  %2290 = vst.msk [vmem:[%s3609_s1 + $0x548] sm:$0xff] %vm2120_vm0, %v1433_v43 }
 0x1da   :  { %v1466_v44 = vpop.trf.xlu1  ;;  %v1434_v45 = vpop.trf.xlu0 }
 0x1db   :  { %2295 = vst.msk [vmem:[%s3609_s1 + $0x570] sm:$0xff] %vm2120_vm0, %v1466_v44  ;;  %2291 = vst.msk [vmem:[%s3609_s1 + $0x550] sm:$0xff] %vm2120_vm0, %v1434_v45 }
 0x1de   :  { %v1467_v46 = vpop.trf.xlu1  ;;  %v1435_v47 = vpop.trf.xlu0 }
 0x1df   :  { %2296 = vst.msk [vmem:[%s3609_s1 + $0x578] sm:$0xff] %vm2120_vm0, %v1467_v46  ;;  %2292 = vst.msk [vmem:[%s3609_s1 + $0x558] sm:$0xff] %vm2120_vm0, %v1435_v47 }
 0x1e2   :  { %v1528_v48 = vpop.trf.xlu1  ;;  %v1496_v49 = vpop.trf.xlu0 }
 0x1e3   :  { %2301 = vst.msk [vmem:[%s3609_s1 + $0x5a0] sm:$0xff] %vm2120_vm0, %v1528_v48  ;;  %2297 = vst.msk [vmem:[%s3609_s1 + $0x580] sm:$0xff] %vm2120_vm0, %v1496_v49 }
 0x1e6   :  { %v1529_v50 = vpop.trf.xlu1  ;;  %v1497_v51 = vpop.trf.xlu0 }
 0x1e7   :  { %2302 = vst.msk [vmem:[%s3609_s1 + $0x5a8] sm:$0xff] %vm2120_vm0, %v1529_v50  ;;  %2298 = vst.msk [vmem:[%s3609_s1 + $0x588] sm:$0xff] %vm2120_vm0, %v1497_v51 }
 0x1ea   :  { %v1530_v52 = vpop.trf.xlu1  ;;  %v1498_v53 = vpop.trf.xlu0 }
 0x1eb   :  { %2303 = vst.msk [vmem:[%s3609_s1 + $0x5b0] sm:$0xff] %vm2120_vm0, %v1530_v52  ;;  %2299 = vst.msk [vmem:[%s3609_s1 + $0x590] sm:$0xff] %vm2120_vm0, %v1498_v53 }
 0x1ee   :  { %v1531_v54 = vpop.trf.xlu1  ;;  %v1499_v55 = vpop.trf.xlu0 }
 0x1ef   :  { %2304 = vst.msk [vmem:[%s3609_s1 + $0x5b8] sm:$0xff] %vm2120_vm0, %v1531_v54  ;;  %2300 = vst.msk [vmem:[%s3609_s1 + $0x598] sm:$0xff] %vm2120_vm0, %v1499_v55 }
 0x1f2   :  { %v1592_v56 = vpop.trf.xlu1  ;;  %v1560_v57 = vpop.trf.xlu0 }
 0x1f3   :  { %2309 = vst.msk [vmem:[%s3609_s1 + $0x5e0] sm:$0xff] %vm2120_vm0, %v1592_v56  ;;  %2305 = vst.msk [vmem:[%s3609_s1 + $0x5c0] sm:$0xff] %vm2120_vm0, %v1560_v57 }
 0x1f6   :  { %v1593_v58 = vpop.trf.xlu1  ;;  %v1561_v59 = vpop.trf.xlu0 }
 0x1f7   :  { %2310 = vst.msk [vmem:[%s3609_s1 + $0x5e8] sm:$0xff] %vm2120_vm0, %v1593_v58  ;;  %2306 = vst.msk [vmem:[%s3609_s1 + $0x5c8] sm:$0xff] %vm2120_vm0, %v1561_v59 }
 0x1fa   :  { %v1594_v60 = vpop.trf.xlu1  ;;  %v1562_v61 = vpop.trf.xlu0 }
 0x1fb   :  { %2311 = vst.msk [vmem:[%s3609_s1 + $0x5f0] sm:$0xff] %vm2120_vm0, %v1594_v60  ;;  %2307 = vst.msk [vmem:[%s3609_s1 + $0x5d0] sm:$0xff] %vm2120_vm0, %v1562_v61 }
 0x1fe   :  { %v1595_v62 = vpop.trf.xlu1  ;;  %v1563_v63 = vpop.trf.xlu0 }
 0x1ff   :  { %2312 = vst.msk [vmem:[%s3609_s1 + $0x5f8] sm:$0xff] %vm2120_vm0, %v1595_v62  ;;  %2308 = vst.msk [vmem:[%s3609_s1 + $0x5d8] sm:$0xff] %vm2120_vm0, %v1563_v63 }
 0x202   :  { %v1656_v0 = vpop.trf.xlu1  ;;  %v1624_v1 = vpop.trf.xlu0 }
 0x203   :  { %2317 = vst.msk [vmem:[%s3609_s1 + $0x620] sm:$0xff] %vm2120_vm0, %v1656_v0  ;;  %2313 = vst.msk [vmem:[%s3609_s1 + $0x600] sm:$0xff] %vm2120_vm0, %v1624_v1 }
 0x206   :  { %v1657_v2 = vpop.trf.xlu1  ;;  %v1625_v3 = vpop.trf.xlu0 }
 0x207   :  { %2318 = vst.msk [vmem:[%s3609_s1 + $0x628] sm:$0xff] %vm2120_vm0, %v1657_v2  ;;  %2314 = vst.msk [vmem:[%s3609_s1 + $0x608] sm:$0xff] %vm2120_vm0, %v1625_v3 }
 0x20a   :  { %v1658_v4 = vpop.trf.xlu1  ;;  %v1626_v5 = vpop.trf.xlu0 }
 0x20b   :  { %2319 = vst.msk [vmem:[%s3609_s1 + $0x630] sm:$0xff] %vm2120_vm0, %v1658_v4  ;;  %2315 = vst.msk [vmem:[%s3609_s1 + $0x610] sm:$0xff] %vm2120_vm0, %v1626_v5 }
 0x20e   :  { %v1659_v6 = vpop.trf.xlu1  ;;  %v1627_v7 = vpop.trf.xlu0 }
 0x20f   :  { %2320 = vst.msk [vmem:[%s3609_s1 + $0x638] sm:$0xff] %vm2120_vm0, %v1659_v6  ;;  %2316 = vst.msk [vmem:[%s3609_s1 + $0x618] sm:$0xff] %vm2120_vm0, %v1627_v7 }
 0x212   :  { %v1720_v8 = vpop.trf.xlu1  ;;  %v1688_v9 = vpop.trf.xlu0 }
 0x213   :  { %2325 = vst.msk [vmem:[%s3609_s1 + $0x660] sm:$0xff] %vm2120_vm0, %v1720_v8  ;;  %2321 = vst.msk [vmem:[%s3609_s1 + $0x640] sm:$0xff] %vm2120_vm0, %v1688_v9 }
 0x216   :  { %v1721_v10 = vpop.trf.xlu1  ;;  %v1689_v11 = vpop.trf.xlu0 }
 0x217   :  { %2326 = vst.msk [vmem:[%s3609_s1 + $0x668] sm:$0xff] %vm2120_vm0, %v1721_v10  ;;  %2322 = vst.msk [vmem:[%s3609_s1 + $0x648] sm:$0xff] %vm2120_vm0, %v1689_v11 }
 0x21a   :  { %v1722_v12 = vpop.trf.xlu1  ;;  %v1690_v13 = vpop.trf.xlu0 }
 0x21b   :  { %2327 = vst.msk [vmem:[%s3609_s1 + $0x670] sm:$0xff] %vm2120_vm0, %v1722_v12  ;;  %2323 = vst.msk [vmem:[%s3609_s1 + $0x650] sm:$0xff] %vm2120_vm0, %v1690_v13 }
 0x21e   :  { %v1723_v14 = vpop.trf.xlu1  ;;  %v1691_v15 = vpop.trf.xlu0 }
 0x21f   :  { %2328 = vst.msk [vmem:[%s3609_s1 + $0x678] sm:$0xff] %vm2120_vm0, %v1723_v14  ;;  %2324 = vst.msk [vmem:[%s3609_s1 + $0x658] sm:$0xff] %vm2120_vm0, %v1691_v15 }
 0x222   :  { %v1784_v16 = vpop.trf.xlu1  ;;  %v1752_v17 = vpop.trf.xlu0 }
 0x223   :  { %2333 = vst.msk [vmem:[%s3609_s1 + $0x6a0] sm:$0xff] %vm2120_vm0, %v1784_v16  ;;  %2329 = vst.msk [vmem:[%s3609_s1 + $0x680] sm:$0xff] %vm2120_vm0, %v1752_v17 }
 0x226   :  { %v1785_v18 = vpop.trf.xlu1  ;;  %v1753_v19 = vpop.trf.xlu0 }
 0x227   :  { %2334 = vst.msk [vmem:[%s3609_s1 + $0x6a8] sm:$0xff] %vm2120_vm0, %v1785_v18  ;;  %2330 = vst.msk [vmem:[%s3609_s1 + $0x688] sm:$0xff] %vm2120_vm0, %v1753_v19 }
 0x22a   :  { %v1786_v20 = vpop.trf.xlu1  ;;  %v1754_v21 = vpop.trf.xlu0 }
 0x22b   :  { %2335 = vst.msk [vmem:[%s3609_s1 + $0x6b0] sm:$0xff] %vm2120_vm0, %v1786_v20  ;;  %2331 = vst.msk [vmem:[%s3609_s1 + $0x690] sm:$0xff] %vm2120_vm0, %v1754_v21 }
 0x22e   :  { %v1787_v22 = vpop.trf.xlu1  ;;  %v1755_v23 = vpop.trf.xlu0 }
 0x22f   :  { %2336 = vst.msk [vmem:[%s3609_s1 + $0x6b8] sm:$0xff] %vm2120_vm0, %v1787_v22  ;;  %2332 = vst.msk [vmem:[%s3609_s1 + $0x698] sm:$0xff] %vm2120_vm0, %v1755_v23 }
 0x232   :  { %v1848_v24 = vpop.trf.xlu1  ;;  %v1816_v25 = vpop.trf.xlu0 }
 0x233   :  { %2341 = vst.msk [vmem:[%s3609_s1 + $0x6e0] sm:$0xff] %vm2120_vm0, %v1848_v24  ;;  %2337 = vst.msk [vmem:[%s3609_s1 + $0x6c0] sm:$0xff] %vm2120_vm0, %v1816_v25 }
 0x236   :  { %v1849_v26 = vpop.trf.xlu1  ;;  %v1817_v27 = vpop.trf.xlu0 }
 0x237   :  { %2342 = vst.msk [vmem:[%s3609_s1 + $0x6e8] sm:$0xff] %vm2120_vm0, %v1849_v26  ;;  %2338 = vst.msk [vmem:[%s3609_s1 + $0x6c8] sm:$0xff] %vm2120_vm0, %v1817_v27 }
 0x23a   :  { %v1850_v28 = vpop.trf.xlu1  ;;  %v1818_v29 = vpop.trf.xlu0 }
 0x23b   :  { %2343 = vst.msk [vmem:[%s3609_s1 + $0x6f0] sm:$0xff] %vm2120_vm0, %v1850_v28  ;;  %2339 = vst.msk [vmem:[%s3609_s1 + $0x6d0] sm:$0xff] %vm2120_vm0, %v1818_v29 }
 0x23e   :  { %v1851_v30 = vpop.trf.xlu1  ;;  %v1819_v31 = vpop.trf.xlu0 }
 0x23f   :  { %2344 = vst.msk [vmem:[%s3609_s1 + $0x6f8] sm:$0xff] %vm2120_vm0, %v1851_v30  ;;  %2340 = vst.msk [vmem:[%s3609_s1 + $0x6d8] sm:$0xff] %vm2120_vm0, %v1819_v31 }
 0x242   :  { %v1912_v32 = vpop.trf.xlu1  ;;  %v1880_v33 = vpop.trf.xlu0 }
 0x243   :  { %2349 = vst.msk [vmem:[%s3609_s1 + $0x720] sm:$0xff] %vm2120_vm0, %v1912_v32  ;;  %2345 = vst.msk [vmem:[%s3609_s1 + $0x700] sm:$0xff] %vm2120_vm0, %v1880_v33 }
 0x246   :  { %v1913_v34 = vpop.trf.xlu1  ;;  %v1881_v35 = vpop.trf.xlu0 }
 0x247   :  { %2350 = vst.msk [vmem:[%s3609_s1 + $0x728] sm:$0xff] %vm2120_vm0, %v1913_v34  ;;  %2346 = vst.msk [vmem:[%s3609_s1 + $0x708] sm:$0xff] %vm2120_vm0, %v1881_v35 }
 0x24a   :  { %v1914_v36 = vpop.trf.xlu1  ;;  %v1882_v37 = vpop.trf.xlu0 }
 0x24b   :  { %2351 = vst.msk [vmem:[%s3609_s1 + $0x730] sm:$0xff] %vm2120_vm0, %v1914_v36  ;;  %2347 = vst.msk [vmem:[%s3609_s1 + $0x710] sm:$0xff] %vm2120_vm0, %v1882_v37 }
 0x24e   :  { %v1915_v38 = vpop.trf.xlu1  ;;  %v1883_v39 = vpop.trf.xlu0 }
 0x24f   :  { %2352 = vst.msk [vmem:[%s3609_s1 + $0x738] sm:$0xff] %vm2120_vm0, %v1915_v38  ;;  %2348 = vst.msk [vmem:[%s3609_s1 + $0x718] sm:$0xff] %vm2120_vm0, %v1883_v39 }
 0x252   :  { %v1976_v40 = vpop.trf.xlu1  ;;  %v1944_v41 = vpop.trf.xlu0 }
 0x253   :  { %2357 = vst.msk [vmem:[%s3609_s1 + $0x760] sm:$0xff] %vm2120_vm0, %v1976_v40  ;;  %2353 = vst.msk [vmem:[%s3609_s1 + $0x740] sm:$0xff] %vm2120_vm0, %v1944_v41 }
 0x256   :  { %v1977_v42 = vpop.trf.xlu1  ;;  %v1945_v43 = vpop.trf.xlu0 }
 0x257   :  { %2358 = vst.msk [vmem:[%s3609_s1 + $0x768] sm:$0xff] %vm2120_vm0, %v1977_v42  ;;  %2354 = vst.msk [vmem:[%s3609_s1 + $0x748] sm:$0xff] %vm2120_vm0, %v1945_v43 }
 0x25a   :  { %v1978_v44 = vpop.trf.xlu1  ;;  %v1946_v45 = vpop.trf.xlu0 }
 0x25b   :  { %2359 = vst.msk [vmem:[%s3609_s1 + $0x770] sm:$0xff] %vm2120_vm0, %v1978_v44  ;;  %2355 = vst.msk [vmem:[%s3609_s1 + $0x750] sm:$0xff] %vm2120_vm0, %v1946_v45 }
 0x25e   :  { %v1979_v46 = vpop.trf.xlu1  ;;  %v1947_v47 = vpop.trf.xlu0 }
 0x25f   :  { %2360 = vst.msk [vmem:[%s3609_s1 + $0x778] sm:$0xff] %vm2120_vm0, %v1979_v46  ;;  %2356 = vst.msk [vmem:[%s3609_s1 + $0x758] sm:$0xff] %vm2120_vm0, %v1947_v47 }
 0x262   :  { %v2040_v48 = vpop.trf.xlu1  ;;  %v2008_v49 = vpop.trf.xlu0 }
 0x263   :  { %2365 = vst.msk [vmem:[%s3609_s1 + $0x7a0] sm:$0xff] %vm2120_vm0, %v2040_v48  ;;  %2361 = vst.msk [vmem:[%s3609_s1 + $0x780] sm:$0xff] %vm2120_vm0, %v2008_v49 }
 0x266   :  { %v2041_v50 = vpop.trf.xlu1  ;;  %v2009_v51 = vpop.trf.xlu0 }
 0x267   :  { %2366 = vst.msk [vmem:[%s3609_s1 + $0x7a8] sm:$0xff] %vm2120_vm0, %v2041_v50  ;;  %2362 = vst.msk [vmem:[%s3609_s1 + $0x788] sm:$0xff] %vm2120_vm0, %v2009_v51 }
 0x26a   :  { %v2042_v52 = vpop.trf.xlu1  ;;  %v2010_v53 = vpop.trf.xlu0 }
 0x26b   :  { %2367 = vst.msk [vmem:[%s3609_s1 + $0x7b0] sm:$0xff] %vm2120_vm0, %v2042_v52  ;;  %2363 = vst.msk [vmem:[%s3609_s1 + $0x790] sm:$0xff] %vm2120_vm0, %v2010_v53 }
 0x26e   :  { %v2043_v54 = vpop.trf.xlu1  ;;  %v2011_v55 = vpop.trf.xlu0 }
 0x26f   :  { %2368 = vst.msk [vmem:[%s3609_s1 + $0x7b8] sm:$0xff] %vm2120_vm0, %v2043_v54  ;;  %2364 = vst.msk [vmem:[%s3609_s1 + $0x798] sm:$0xff] %vm2120_vm0, %v2011_v55 }
 0x272   :  { %v2104_v56 = vpop.trf.xlu1  ;;  %v2072_v57 = vpop.trf.xlu0 }
 0x273   :  { %2373 = vst.msk [vmem:[%s3609_s1 + $0x7e0] sm:$0xff] %vm2120_vm0, %v2104_v56  ;;  %2369 = vst.msk [vmem:[%s3609_s1 + $0x7c0] sm:$0xff] %vm2120_vm0, %v2072_v57 }
 0x276   :  { %v2105_v58 = vpop.trf.xlu1  ;;  %v2073_v59 = vpop.trf.xlu0 }
 0x277   :  { %2374 = vst.msk [vmem:[%s3609_s1 + $0x7e8] sm:$0xff] %vm2120_vm0, %v2105_v58  ;;  %2370 = vst.msk [vmem:[%s3609_s1 + $0x7c8] sm:$0xff] %vm2120_vm0, %v2073_v59 }
 0x27a   :  { %v2106_v60 = vpop.trf.xlu1  ;;  %v2074_v61 = vpop.trf.xlu0 }
 0x27b   :  { %2375 = vst.msk [vmem:[%s3609_s1 + $0x7f0] sm:$0xff] %vm2120_vm0, %v2106_v60  ;;  %2371 = vst.msk [vmem:[%s3609_s1 + $0x7d0] sm:$0xff] %vm2120_vm0, %v2074_v61 }
 0x27e   :  { %v2107_v62 = vpop.trf.xlu1  ;;  %v2075_v63 = vpop.trf.xlu0 }
 0x27f   :  { %2376 = vst.msk [vmem:[%s3609_s1 + $0x7f8] sm:$0xff] %vm2120_vm0, %v2107_v62  ;;  %2372 = vst.msk [vmem:[%s3609_s1 + $0x7d8] sm:$0xff] %vm2120_vm0, %v2075_v63 }

</bundles_post_ra>
